<compile_context>
chip_gen: v7x
topology: tpu7x:2x2x1
jax: 0.10.0
libtpu: 0.0.40
codegen_flags: <defaults>
</compile_context>

<pallas_src>
import jax
import jax.numpy as jnp
from jax.experimental import pallas as pl
from jax.experimental.pallas import tpu as pltpu

HIDDEN = 256
N_CLASSES = 7
N_PAD = 128        # lane-aligned width for the out_proj MXU operand (zero-padded from 7)
N_STORE = 8        # columns actually written back to HBM (>= N_CLASSES)


def _cls_head_kernel(x_ref, w1_ref, b1_ref, w2_ref, b2_ref, out_ref):
    # x_ref:   (TB, 256)   f32  VMEM (pipelined per grid step)
    # w1_ref:  (256, 256)  bf16 VMEM (block-invariant -> resident)
    # b1_ref:  (1, 256)    f32  VMEM (resident)
    # w2_ref:  (256, 128)  bf16 VMEM (resident, zero-padded from 7 cols)
    # b2_ref:  (1, 128)    f32  VMEM (resident, zero-padded from 7)
    # out_ref: (TB, 8)     f32  VMEM (only first 7 cols meaningful)
    x = x_ref[...].astype(jnp.bfloat16)   # cast in VMEM; HBM read of x stays a single f32 pass

    # dense: x @ W1 + b1, dropout(p=0.0) == identity, relu  (bias + relu in f32)
    h = jnp.dot(x, w1_ref[...], preferred_element_type=jnp.float32)
    h = jnp.maximum(h + b1_ref[...], 0.0)

    # out_proj: h @ W2 + b2, relu  (h cast to bf16 for the MXU, f32 accumulate)
    o = jnp.dot(h.astype(jnp.bfloat16), w2_ref[...],
                preferred_element_type=jnp.float32)
    o = jnp.maximum(o + b2_ref[...], 0.0)

    # Lane-narrow store: keep only 8 of the 128 computed columns (padded cols are
    # exactly 0 through relu and are discarded); ~16x less HBM writeback.
    out_ref[...] = o[:, :N_STORE].astype(out_ref.dtype)


def _tile_budget():
    """Pick (max batch tile, vmem limit) from the generation's physical VMEM."""
    vmem_cap = None
    try:
        vmem_cap = getattr(pltpu.get_tpu_info(), "vmem_capacity_bytes", None)
    except Exception:
        vmem_cap = None
    if vmem_cap is not None and vmem_cap >= 100 * 1024 * 1024:
        # v5e / v6e: 128 MiB physical VMEM -> big tiles amortize ~0.35us/step overhead.
        return 8192, 80 * 1024 * 1024
    # v7x (64 MiB physical) or unknown: stay conservative.
    return 4096, 48 * 1024 * 1024


def classification_head(x, w1, b1, w2, b2):
    """x: (B, 256) f32; w1: (256, 256); b1: (256,); w2: (256, 7); b2: (7,).

    Returns (B, 7) f32, matching relu(relu(x @ w1 + b1) @ w2 + b2).
    """
    x = x.astype(jnp.float32)
    B = x.shape[0]

    max_tb, vmem_limit = _tile_budget()
    TB = min(((B + 7) // 8) * 8, max_tb)          # multiple of 8 sublanes
    grid = (pl.cdiv(B, TB),)                      # ragged last block handled by Pallas

    # Operand prep (weights only; no pass over the activation x).
    w1_b = w1.astype(jnp.bfloat16)
    b1_2d = b1.reshape(1, HIDDEN).astype(jnp.float32)
    w2_p = jnp.zeros((HIDDEN, N_PAD), jnp.bfloat16).at[:, :N_CLASSES].set(
        w2.astype(jnp.bfloat16))
    b2_p = jnp.zeros((1, N_PAD), jnp.float32).at[0, :N_CLASSES].set(
        b2.astype(jnp.float32))

    flops = 2 * B * HIDDEN * (HIDDEN + N_PAD)
    bytes_accessed = (B * HIDDEN * 4            # x read (f32)
                      + HIDDEN * HIDDEN * 2     # w1 bf16
                      + HIDDEN * 4              # b1
                      + HIDDEN * N_PAD * 2      # w2 bf16 (padded)
                      + N_PAD * 4               # b2 (padded)
                      + B * N_STORE * 4)        # narrow output write

    out = pl.pallas_call(
        _cls_head_kernel,
        out_shape=jax.ShapeDtypeStruct((B, N_STORE), jnp.float32),
        grid=grid,
        in_specs=[
            pl.BlockSpec((TB, HIDDEN), lambda i: (i, 0)),        # x tile (pipelined)
            pl.BlockSpec((HIDDEN, HIDDEN), lambda i: (0, 0)),    # w1 (resident)
            pl.BlockSpec((1, HIDDEN), lambda i: (0, 0)),         # b1 (resident)
            pl.BlockSpec((HIDDEN, N_PAD), lambda i: (0, 0)),     # w2 padded (resident)
            pl.BlockSpec((1, N_PAD), lambda i: (0, 0)),          # b2 padded (resident)
        ],
        out_specs=pl.BlockSpec((TB, N_STORE), lambda i: (i, 0)),
        compiler_params=pltpu.CompilerParams(
            dimension_semantics=("parallel",),   # megacore split on v7x; no-op v5e/v6e
            vmem_limit_bytes=vmem_limit,
        ),
        cost_estimate=pl.CostEstimate(
            flops=flops, transcendentals=0, bytes_accessed=bytes_accessed),
    )(x, w1_b, b1_2d, w2_p, b2_p)

    return out[:, :N_CLASSES]


def _ref_forward_bf16(x, w1, b1, w2, b2):
    """Reference mimicking the kernel's bf16 operand casts (f32 accumulate)."""
    xb = x.astype(jnp.bfloat16).astype(jnp.float32)
    w1b = w1.astype(jnp.bfloat16).astype(jnp.float32)
    w2b = w2.astype(jnp.bfloat16).astype(jnp.float32)
    h = jnp.maximum(xb @ w1b + b1, 0.0)
    hb = h.astype(jnp.bfloat16).astype(jnp.float32)
    return jnp.maximum(hb @ w2b + b2, 0.0)


def _ref_forward_f32(x, w1, b1, w2, b2):
    h = jnp.maximum(x @ w1 + b1, 0.0)
    return jnp.maximum(h @ w2 + b2, 0.0)


if __name__ == "__main__":
    key = jax.random.PRNGKey(0)
    k_x, k_w1, k_b1, k_w2, k_b2 = jax.random.split(key, 5)

    B = 8  # small batch
    # Deterministic synthetic params (shapes match nn.Linear(256,256) and nn.Linear(256,7)).
    x = jax.random.normal(k_x, (B, HIDDEN), dtype=jnp.float32)
    w1 = jax.random.normal(k_w1, (HIDDEN, HIDDEN), dtype=jnp.float32) * 0.05
    b1 = jax.random.normal(k_b1, (HIDDEN,), dtype=jnp.float32) * 0.05
    w2 = jax.random.normal(k_w2, (HIDDEN, N_CLASSES), dtype=jnp.float32) * 0.05
    b2 = jax.random.normal(k_b2, (N_CLASSES,), dtype=jnp.float32) * 0.05

    out = classification_head(x, w1, b1, w2, b2)
    out = jax.block_until_ready(out)

    assert out.shape == (B, N_CLASSES), out.shape

    # Tight check against a reference replicating the kernel's bf16 operand casts.
    ref_bf16 = _ref_forward_bf16(x, w1, b1, w2, b2)
    assert jnp.allclose(out, ref_bf16, atol=2e-3, rtol=2e-3), \
        "mismatch vs bf16-operand reference"

    # Loose check against the pure-f32 PyTorch-equivalent forward.
    ref_f32 = _ref_forward_f32(x, w1, b1, w2, b2)
    assert jnp.allclose(out, ref_f32, atol=5e-2, rtol=5e-2), \
        "mismatch vs f32 reference"

    print("KERNEL_OK")
</pallas_src>

<mosaic_0001>
module attributes {stable_mosaic.version = 11 : i64} {
  func.func @_cls_head_kernel(%arg0: i32, %arg1: memref<8x256xf32, #tpu.memory_space<vmem>>, %arg2: memref<256x256xbf16, #tpu.memory_space<vmem>>, %arg3: memref<1x256xf32, #tpu.memory_space<vmem>>, %arg4: memref<256x128xbf16, #tpu.memory_space<vmem>>, %arg5: memref<1x128xf32, #tpu.memory_space<vmem>>, %arg6: memref<8x8xf32, #tpu.memory_space<vmem>>) attributes {dimension_semantics = [#tpu.dimension_semantics<parallel>], iteration_bounds = array<i64: 1>, scalar_prefetch = 0 : i64, scratch_operands = 0 : i64, tpu.core_type = #tpu.core_type<tc>, window_params = [{transform_indices = @transform_0, window_bounds = array<i64: 8, 256>}, {pipeline_mode = #tpu.pipeline_mode<synchronous>, transform_indices = @transform_1, window_bounds = array<i64: 256, 256>}, {pipeline_mode = #tpu.pipeline_mode<synchronous>, transform_indices = @transform_2, window_bounds = array<i64: 1, 256>}, {pipeline_mode = #tpu.pipeline_mode<synchronous>, transform_indices = @transform_3, window_bounds = array<i64: 256, 128>}, {pipeline_mode = #tpu.pipeline_mode<synchronous>, transform_indices = @transform_4, window_bounds = array<i64: 1, 128>}, {transform_indices = @transform_5, window_bounds = array<i64: 8, 8>}]} {
    %c0 = arith.constant 0 : index
    %c0_0 = arith.constant 0 : index
    %0 = vector.load %arg1[%c0, %c0_0] : memref<8x256xf32, #tpu.memory_space<vmem>>, vector<8x256xf32>
    %1 = arith.truncf %0 : vector<8x256xf32> to vector<8x256xbf16>
    %c0_1 = arith.constant 0 : index
    %c0_2 = arith.constant 0 : index
    %2 = vector.load %arg2[%c0_1, %c0_2] : memref<256x256xbf16, #tpu.memory_space<vmem>>, vector<256x256xbf16>
    %cst = arith.constant dense<0.000000e+00> : vector<8x256xf32>
    %3 = tpu.matmul %1, %2, %cst {dimension_numbers = #tpu.dot_dimension_numbers<[1], [0], [0], [1], [0, 0, 1, 1], [], []>} : vector<8x256xbf16>, vector<256x256xbf16>, vector<8x256xf32> -> vector<8x256xf32>
    %c0_3 = arith.constant 0 : index
    %c0_4 = arith.constant 0 : index
    %4 = vector.load %arg3[%c0_3, %c0_4] : memref<1x256xf32, #tpu.memory_space<vmem>>, vector<1x256xf32>
    %5 = vector.broadcast %4 : vector<1x256xf32> to vector<8x256xf32>
    %6 = arith.addf %3, %5 : vector<8x256xf32>
    %cst_5 = arith.constant 0.000000e+00 : f32
    %7 = vector.broadcast %cst_5 : f32 to vector<8x256xf32>
    %8 = arith.maximumf %6, %7 : vector<8x256xf32>
    %9 = arith.truncf %8 : vector<8x256xf32> to vector<8x256xbf16>
    %c0_6 = arith.constant 0 : index
    %c0_7 = arith.constant 0 : index
    %10 = vector.load %arg4[%c0_6, %c0_7] : memref<256x128xbf16, #tpu.memory_space<vmem>>, vector<256x128xbf16>
    %cst_8 = arith.constant dense<0.000000e+00> : vector<8x128xf32>
    %11 = tpu.matmul %9, %10, %cst_8 {dimension_numbers = #tpu.dot_dimension_numbers<[1], [0], [0], [1], [0, 0, 1, 1], [], []>} : vector<8x256xbf16>, vector<256x128xbf16>, vector<8x128xf32> -> vector<8x128xf32>
    %c0_9 = arith.constant 0 : index
    %c0_10 = arith.constant 0 : index
    %12 = vector.load %arg5[%c0_9, %c0_10] : memref<1x128xf32, #tpu.memory_space<vmem>>, vector<1x128xf32>
    %13 = vector.broadcast %12 : vector<1x128xf32> to vector<8x128xf32>
    %14 = arith.addf %11, %13 : vector<8x128xf32>
    %cst_11 = arith.constant 0.000000e+00 : f32
    %15 = vector.broadcast %cst_11 : f32 to vector<8x128xf32>
    %16 = arith.maximumf %14, %15 : vector<8x128xf32>
    %17 = vector.extract_strided_slice %16 {offsets = [0, 0], sizes = [8, 8], strides = [1, 1]} : vector<8x128xf32> to vector<8x8xf32>
    %c0_12 = arith.constant 0 : index
    %c0_13 = arith.constant 0 : index
    %18 = vector.load %arg6[%c0_12, %c0_13] : memref<8x8xf32, #tpu.memory_space<vmem>>, vector<8x8xf32>
    tpu.vector_store %arg6[%c0_12, %c0_13], %17 {strides = array<i32>} : memref<8x8xf32, #tpu.memory_space<vmem>>, vector<8x8xf32>,
    return
  }
  func.func @transform_0(%arg0: i32) -> (i32, i32) {
    %c0_i32 = arith.constant 0 : i32
    %c0_i32_0 = arith.constant 0 : i32
    return %arg0, %c0_i32 : i32, i32
  }
  func.func @transform_1(%arg0: i32) -> (i32, i32) {
    %c0_i32 = arith.constant 0 : i32
    %c0_i32_0 = arith.constant 0 : i32
    %c0_i32_1 = arith.constant 0 : i32
    return %c0_i32, %c0_i32_0 : i32, i32
  }
  func.func @transform_2(%arg0: i32) -> (i32, i32) {
    %c0_i32 = arith.constant 0 : i32
    %c0_i32_0 = arith.constant 0 : i32
    %c0_i32_1 = arith.constant 0 : i32
    return %c0_i32, %c0_i32_0 : i32, i32
  }
  func.func @transform_3(%arg0: i32) -> (i32, i32) {
    %c0_i32 = arith.constant 0 : i32
    %c0_i32_0 = arith.constant 0 : i32
    %c0_i32_1 = arith.constant 0 : i32
    return %c0_i32, %c0_i32_0 : i32, i32
  }
  func.func @transform_4(%arg0: i32) -> (i32, i32) {
    %c0_i32 = arith.constant 0 : i32
    %c0_i32_0 = arith.constant 0 : i32
    %c0_i32_1 = arith.constant 0 : i32
    return %c0_i32, %c0_i32_0 : i32, i32
  }
  func.func @transform_5(%arg0: i32) -> (i32, i32) {
    %c0_i32 = arith.constant 0 : i32
    %c0_i32_0 = arith.constant 0 : i32
    return %arg0, %c0_i32 : i32, i32
  }
}

</mosaic_0001>

<bundles_post_ra>
// kernel: tpu_custom_call.1
= control target key start
LH: loop header
LB: loop body
LE: loop exit
PB: predicated region body
PF: predicated region fallthrough
CT: control target
= control target key end

     0   :  { %10 = vsyncpa [#allocation3], 0  ;;  %s837_s0 = inlined_call_operand.hbm [shape: f32[8,256], index: 0, kind: input, shape index: {}]   ;;  %s838_s1 = inlined_call_operand.hbm [shape: bf16[256,256], index: 1, kind: input, shape index: {}]   ;;  %s839_s2 = inlined_call_operand.vmem [shape: f32[1,256], index: 2, kind: input, shape index: {}]   ;;  %s840_s3 = inlined_call_operand.hbm [shape: bf16[256,128], index: 3, kind: input, shape index: {}]   ;;  %s841_s4 = inlined_call_operand.vmem [shape: f32[1,128], index: 4, kind: input, shape index: {}]   ;;  %s842_s5 = inlined_call_operand.hbm [shape: f32[8,8], index: 5, kind: output, shape index: {}]  }
   0x1   :  { %11 = vsyncpa [#allocation6], 0 }
   0x2   :  { %12 = vsyncpa [#allocation4], 0  ;;  %s745_s18 = smov [#allocation5]   ;;  %s651_s22 = scalar_lea.hbm %s838_s1, 4096 }
   0x3   :  { %s28_s19 = sshll.u32 %s745_s18, 4  ;;  %p652_p0 = scmp.ne.s32.totalorder %s838_s1, %s651_s22  ;;  %s29_s19 = int_to_ptr.vmem [resolvable:$true] %s28_s19 }
   0x4   :  { %p655_p1 = scmp.lt.u32.totalorder %s651_s22, %s838_s1 }
   0x6   :  { %p657_p2 = pnand %p655_p1, %p652_p0 }
   0x8   :  { %660 = shalt.err (!%p657_p2)
}
   0x9   :  { %s661_s27 = scalar_lea.vmem %s29_s19, 4096  ;;  %p666_p4 = scmp.lt.s32.totalorder %s29_s19, %s29_s19 }
   0xa   :  { %p662_p3 = scmp.ne.s32.totalorder %s29_s19, %s661_s27  ;;  %p667_p5 = scmp.lt.s32.totalorder %s661_s27, %s661_s27 }
   0xc   :  { %p668_p6 = por %p667_p5, %p666_p4 }
   0xe   :  { %p669_p7 = pnand %p668_p6, %p662_p3 }
  0x10   :  { %672 = shalt.err (!%p669_p7)
}
  0x11   :  { %s746_s28 = smov 128   ;;  %s747_s29 = smov 8  }
  0x12   :  { %34 = dma.hbm_to_vmem [thread:$0]  %s838_s1, 4096, %s29_s19, [#allocation6], %s746_s28, %s746_s28, %s747_s29  }
  0x13   :  { %s748_s7 = smov [#allocation2]   ;;  %s749_s9 = smov [#allocation7]  }
  0x14   :  { %s19_s8 = sshll.u32 %s748_s7, 4  ;;  %s42_s10 = sshll.u32 %s749_s9, 4  ;;  %s20_s8 = int_to_ptr.vmem [resolvable:$true] %s19_s8  ;;  %s43_s10 = int_to_ptr.vmem [resolvable:$true] %s42_s10 }
  0x15   :  { %s673_s13 = scalar_lea.hbm %s837_s0, 256 }
  0x16   :  { %p674_p8 = scmp.ne.s32.totalorder %s837_s0, %s673_s13  ;;  %p677_p9 = scmp.lt.u32.totalorder %s673_s13, %s837_s0 }
  0x18   :  { %p679_p10 = pnand %p677_p9, %p674_p8 }
  0x1a   :  { %682 = shalt.err (!%p679_p10)
}
  0x1b   :  { %s683_s1 = scalar_lea.vmem %s20_s8, 256  ;;  %p688_p12 = scmp.lt.s32.totalorder %s20_s8, %s20_s8 }
  0x1c   :  { %p684_p11 = scmp.ne.s32.totalorder %s20_s8, %s683_s1  ;;  %p689_p13 = scmp.lt.s32.totalorder %s683_s1, %s683_s1 }
  0x1e   :  { %p690_p0 = por %p689_p13, %p688_p12 }
  0x20   :  { %p691_p1 = pnand %p690_p0, %p684_p11 }
  0x22   :  { %694 = shalt.err (!%p691_p1)
}
  0x23   :  { %22 = dma.hbm_to_vmem [thread:$0]  %s837_s0, 256, %s20_s8, [#allocation3]  }
  0x24   :  { %s695_s22 = scalar_lea.hbm %s840_s3, 2048 }
  0x25   :  { %p696_p2 = scmp.ne.s32.totalorder %s840_s3, %s695_s22  ;;  %p699_p3 = scmp.lt.u32.totalorder %s695_s22, %s840_s3 }
  0x27   :  { %p701_p4 = pnand %p699_p3, %p696_p2 }
  0x29   :  { %704 = shalt.err (!%p701_p4)
}
  0x2a   :  { %s705_s27 = scalar_lea.vmem %s43_s10, 2048  ;;  %p710_p6 = scmp.lt.s32.totalorder %s43_s10, %s43_s10 }
  0x2b   :  { %p706_p5 = scmp.ne.s32.totalorder %s43_s10, %s705_s27  ;;  %p711_p7 = scmp.lt.s32.totalorder %s705_s27, %s705_s27 }
  0x2d   :  { %p712_p8 = por %p711_p7, %p710_p6 }
  0x2f   :  { %p713_p9 = pnand %p712_p8, %p706_p5 }
  0x31   :  { %716 = shalt.err (!%p713_p9)
}
  0x32   :  { %s750_s0 = smov 64   ;;  %s751_s28 = smov 4  }
  0x33   :  { %48 = dma.hbm_to_vmem [thread:$0]  %s840_s3, 2048, %s43_s10, [#allocation6], %s750_s0, %s750_s0, %s751_s28  }
  0x34   :  { %739 = dma.done.wait [#allocation3], 256  }
  0x35   :  { %740 = vsyncadd [#allocation3], 4294967040 }
  0x36   :  { %741 = dma.done.wait [#allocation6], 6144  }
  0x37   :  { %742 = vsyncadd [#allocation6], 4294961152  ;;  %v587_v0 = vld [vmem:[#allocation5 + $0x4] ss:$8 sps:$4 sm:$0xff]   ;;  %v589_v1 = vld [vmem:[#allocation5] ss:$8 sps:$4 sm:$0xff]   ;;  %v99_v52 = vlaneseq }
  0x38   :  { %269 = vmatprep.subr.bf16.mxu0 %v587_v0  ;;  %v590_v2 = vld [vmem:[#allocation5 + $0x14] ss:$8 sps:$4 sm:$0xff]   ;;  %v592_v3 = vld [vmem:[#allocation5 + $0x10] ss:$8 sps:$4 sm:$0xff]   ;;  %v593_v4 = vld [vmem:[#allocation5 + $0x24] ss:$8 sps:$4 sm:$0xff]  }
  0x39   :  { %270 = vmatpush1.bf16.msra.mxu0 %v589_v1  ;;  %v595_v5 = vld [vmem:[#allocation5 + $0x20] ss:$8 sps:$4 sm:$0xff]   ;;  %v596_v6 = vld [vmem:[#allocation5 + $0x34] ss:$8 sps:$4 sm:$0xff]   ;;  %v598_v7 = vld [vmem:[#allocation5 + $0x30] ss:$8 sps:$4 sm:$0xff]  }
  0x3a   :  { %271 = vmatprep.subr.bf16.mxu0 %v590_v2  ;;  %v599_v8 = vld [vmem:[#allocation5 + $0x44] ss:$8 sps:$4 sm:$0xff]   ;;  %v601_v9 = vld [vmem:[#allocation5 + $0x40] ss:$8 sps:$4 sm:$0xff]   ;;  %v602_v10 = vld [vmem:[#allocation5 + $0x54] ss:$8 sps:$4 sm:$0xff]  }
  0x3b   :  { %v604_v11 = vld [vmem:[#allocation5 + $0x50] ss:$8 sps:$4 sm:$0xff]   ;;  %v605_v12 = vld [vmem:[#allocation5 + $0x64] ss:$8 sps:$4 sm:$0xff]   ;;  %v607_v13 = vld [vmem:[#allocation5 + $0x60] ss:$8 sps:$4 sm:$0xff]  }
  0x3c   :  { %v62_v14 = vld [vmem:[#allocation2 + $0x8] sm:$0xff]  ;;  %v635_v17 = vld [vmem:[#allocation7 + $0x40] sm:$0xff]   ;;  %v637_v19 = vld [vmem:[#allocation7 + $0x48] sm:$0xff]   ;;  %v100_v53 = vshrl.u32 %v99_v52, 7  ;;  %vm490_vm0 = vcmask 64512  }
  0x3d   :  { %272 = vmatpush1.bf16.msra.mxu0 %v592_v3  ;;  %v608_v15 = vld [vmem:[#allocation5 + $0x74] ss:$8 sps:$4 sm:$0xff]   ;;  %v64_v16 = vpack.c.bf16 %v62_v14, %v62_v14  ;;  %v636_v18 = vld [vmem:[#allocation7] sm:$0xff]   ;;  %v610_v20 = vld [vmem:[#allocation5 + $0x70] ss:$8 sps:$4 sm:$0xff]   ;;  %557 = vmatprep.subr.bf16.mxu1 %v635_v17 }
  0x3e   :  { %273 = vmatprep.subr.bf16.mxu0 %v593_v4  ;;  %558 = vmatpush3.bf16.msra.mxu1 %v636_v18  ;;  %v638_v21 = vld [vmem:[#allocation7 + $0x8] sm:$0xff]   ;;  %v639_v22 = vld [vmem:[#allocation7 + $0x50] sm:$0xff]   ;;  %v641_v26 = vld [vmem:[#allocation7 + $0x58] sm:$0xff]   ;;  %v101_v54 = vsub.s32 0, %v100_v53  ;;  %v105_v56 = vsub.s32 1, %v100_v53 }
  0x3f   :  { %301 = vmatprep.mubr.bf16.mxu0 %v64_v16  ;;  %559 = vmatprep.subr.bf16.mxu1 %v637_v19  ;;  %v611_v23 = vld [vmem:[#allocation5 + $0x84] ss:$8 sps:$4 sm:$0xff]   ;;  %v613_v24 = vld [vmem:[#allocation5 + $0x80] ss:$8 sps:$4 sm:$0xff]   ;;  %v640_v25 = vld [vmem:[#allocation7 + $0x10] sm:$0xff]  }
  0x40   :  { %v614_v27 = vld [vmem:[#allocation5 + $0x94] ss:$8 sps:$4 sm:$0xff]   ;;  %v616_v28 = vld [vmem:[#allocation5 + $0x90] ss:$8 sps:$4 sm:$0xff]   ;;  %v617_v30 = vld [vmem:[#allocation5 + $0xa4] ss:$8 sps:$4 sm:$0xff]  }
  0x41   :  { %274 = vmatpush1.bf16.msra.mxu0 %v595_v5  ;;  %v642_v29 = vld [vmem:[#allocation7 + $0x18] sm:$0xff]   ;;  %v643_v31 = vld [vmem:[#allocation7 + $0x60] sm:$0xff]   ;;  %v645_v34 = vld [vmem:[#allocation7 + $0x68] sm:$0xff]  }
  0x42   :  { %275 = vmatprep.subr.bf16.mxu0 %v596_v6  ;;  %560 = vmatpush3.bf16.msra.mxu1 %v638_v21  ;;  %v644_v32 = vld [vmem:[#allocation7 + $0x20] sm:$0xff]   ;;  %v620_v35 = vld [vmem:[#allocation5 + $0xb4] ss:$8 sps:$4 sm:$0xff]   ;;  %v646_v36 = vld [vmem:[#allocation7 + $0x28] sm:$0xff]  }
  0x43   :  { %561 = vmatprep.subr.bf16.mxu1 %v639_v22  ;;  %v619_v33 = vld [vmem:[#allocation5 + $0xa0] ss:$8 sps:$4 sm:$0xff]   ;;  %v622_v37 = vld [vmem:[#allocation5 + $0xb0] ss:$8 sps:$4 sm:$0xff]   ;;  %v623_v38 = vld [vmem:[#allocation5 + $0xc4] ss:$8 sps:$4 sm:$0xff]  }
  0x44   :  { %v625_v39 = vld [vmem:[#allocation5 + $0xc0] ss:$8 sps:$4 sm:$0xff]   ;;  %v626_v40 = vld [vmem:[#allocation5 + $0xd4] ss:$8 sps:$4 sm:$0xff]   ;;  %v628_v41 = vld [vmem:[#allocation5 + $0xd0] ss:$8 sps:$4 sm:$0xff]  }
  0x45   :  { %276 = vmatpush1.bf16.msra.mxu0 %v598_v7  ;;  %v629_v42 = vld [vmem:[#allocation5 + $0xe4] ss:$8 sps:$4 sm:$0xff]   ;;  %v631_v43 = vld [vmem:[#allocation5 + $0xe0] ss:$8 sps:$4 sm:$0xff]   ;;  %v632_v44 = vld [vmem:[#allocation5 + $0xf4] ss:$8 sps:$4 sm:$0xff]  }
  0x46   :  { %277 = vmatprep.subr.bf16.mxu0 %v599_v8  ;;  %562 = vmatpush3.bf16.msra.mxu1 %v640_v25  ;;  %v634_v45 = vld [vmem:[#allocation5 + $0xf0] ss:$8 sps:$4 sm:$0xff]  }
  0x47   :  { %563 = vmatprep.subr.bf16.mxu1 %v641_v26  ;;  %v61_v46 = vld [vmem:[#allocation2] sm:$0xff]  ;;  %v649_v50 = vld [vmem:[#allocation7 + $0x78] sm:$0xff]  }
  0x48   :  { %v63_v47 = vpack.c.bf16 %v61_v46, %v61_v46  ;;  %v647_v48 = vld [vmem:[#allocation7 + $0x70] sm:$0xff]   ;;  %v650_v51 = vld [vmem:[#allocation7 + $0x38] sm:$0xff]  }
  0x49   :  { %278 = vmatpush1.bf16.msra.mxu0 %v601_v9  ;;  %v648_v49 = vld [vmem:[#allocation7 + $0x30] sm:$0xff]  }
  0x4a   :  { %279 = vmatprep.subr.bf16.mxu0 %v602_v10  ;;  %564 = vmatpush3.bf16.msra.mxu1 %v642_v29  ;;  %v97_v55 = vld [vmem:[%s839_s2] sm:$0x3]  ;;  %s752_s2 = smov [#allocation8]  }
  0x4b   :  { %565 = vmatprep.subr.bf16.mxu1 %v643_v31  ;;  %v102_v57 = vrot.slane %v97_v55, %v101_v54  ;;  %v106_v58 = vrot.slane %v97_v55, %v105_v56  ;;  %v540_v6 = vld [vmem:[%s841_s4] ss:$0 sm:$0xff]  ;;  %s498_s9 = sshll.u32 %s752_s2, 4  ;;  %s499_s9 = int_to_ptr.vmem [resolvable:$true] %s498_s9 }
  0x4c   :  { %s717_s10 = scalar_lea.vmem %s499_s9, 128  ;;  %p722_p11 = scmp.lt.s32.totalorder %s499_s9, %s499_s9 }
  0x4d   :  { %280 = vmatpush1.bf16.msra.mxu0 %v604_v11  ;;  %p718_p10 = scmp.ne.s32.totalorder %s499_s9, %s717_s10  ;;  %p723_p12 = scmp.lt.s32.totalorder %s717_s10, %s717_s10 }
  0x4e   :  { %281 = vmatprep.subr.bf16.mxu0 %v605_v12  ;;  %566 = vmatpush3.bf16.msra.mxu1 %v644_v32 }
  0x4f   :  { %567 = vmatprep.subr.bf16.mxu1 %v645_v34  ;;  %p724_p13 = por %p723_p12, %p722_p11 }
  0x51   :  { %282 = vmatpush1.bf16.msra.mxu0 %v607_v13  ;;  %p725_p0 = pnand %p724_p13, %p718_p10 }
  0x52   :  { %283 = vmatprep.subr.bf16.mxu0 %v608_v15  ;;  %568 = vmatpush3.bf16.msra.mxu1 %v646_v36 }
  0x53   :  { %569 = vmatprep.subr.bf16.mxu1 %v647_v48 }
  0x55   :  { %284 = vmatpush1.bf16.msra.mxu0 %v610_v20 }
  0x56   :  { %285 = vmatprep.subr.bf16.mxu0 %v611_v23  ;;  %570 = vmatpush3.bf16.msra.mxu1 %v648_v49 }
  0x57   :  { %571 = vmatprep.subr.bf16.mxu1 %v649_v50 }
  0x59   :  { %286 = vmatpush1.bf16.msra.mxu0 %v613_v24 }
  0x5a   :  { %287 = vmatprep.subr.bf16.mxu0 %v614_v27  ;;  %572 = vmatpush3.bf16.msra.mxu1 %v650_v51 }
  0x5d   :  { %288 = vmatpush1.bf16.msra.mxu0 %v616_v28 }
  0x5e   :  { %289 = vmatprep.subr.bf16.mxu0 %v617_v30 }
  0x61   :  { %290 = vmatpush1.bf16.msra.mxu0 %v619_v33 }
  0x62   :  { %291 = vmatprep.subr.bf16.mxu0 %v620_v35 }
  0x65   :  { %292 = vmatpush1.bf16.msra.mxu0 %v622_v37 }
  0x66   :  { %293 = vmatprep.subr.bf16.mxu0 %v623_v38 }
  0x69   :  { %294 = vmatpush1.bf16.msra.mxu0 %v625_v39 }
  0x6a   :  { %295 = vmatprep.subr.bf16.mxu0 %v626_v40 }
  0x6d   :  { %296 = vmatpush1.bf16.msra.mxu0 %v628_v41 }
  0x6e   :  { %297 = vmatprep.subr.bf16.mxu0 %v629_v42 }
  0x71   :  { %298 = vmatpush1.bf16.msra.mxu0 %v631_v43 }
  0x72   :  { %299 = vmatprep.subr.bf16.mxu0 %v632_v44 }
  0x75   :  { %300 = vmatpush1.bf16.msra.mxu0 %v634_v45 }
  0x78   :  { %302 = vmatmul.mubr.bf16.vlgmr.msra.gmra.mrb[0].mxu0 %v63_v47 }
 0x14b   :  { %v303_v59 = vpop.f32.mrb[0].mxu0 }
 0x14c   :  { %v304_v60 = vadd.f32 %v303_v59, %v102_v57  ;;  %v305_v61 = vpop.f32.mrb[1].mxu0 }
 0x14d   :  { %v306_v62 = vadd.f32 %v305_v61, %v106_v58  ;;  %v307_v63 = vpop.f32.mrb[2].mxu0 }
 0x14e   :  { %v310_v0 = vmax.f32 %v304_v60, 0.0  ;;  %v308_v1 = vpop.f32.mrb[3].mxu0 }
 0x14f   :  { %v311_v2 = vmax.f32 %v306_v62, 0.0 }
 0x150   :  { %v312_v4 = vpack.c.bf16 %v310_v0, %v310_v0 }
 0x151   :  { %v313_v3 = vpack.c.bf16 %v311_v2, %v311_v2 }
 0x153   :  { %481 = vmatprep.mubr.bf16.mxu1 %v313_v3 }
 0x154   :  { %482 = vmatmul.mubr.bf16.vlgmr.msra.gmra.mrb[0].mxu1 %v312_v4 }
 0x227   :  { %v573_v5 = vpop.f32.mrb[0].mxu1 }
 0x228   :  { %v574_v7 = vpop.f32.mrb[1].mxu1 }
 0x229   :  { %v575_v8 = vadd.f32 %v574_v7, %v573_v5  ;;  %v576_v9 = vpop.f32.mrb[2].mxu1 }
 0x22a   :  { %v577_v10 = vpop.f32.mrb[3].mxu1 }
 0x22b   :  { %v484_v11 = vadd.f32 %v575_v8, %v540_v6 }
 0x22d   :  { %v489_v12 = vmax.f32 %v484_v11, 0.0 }
 0x22f   :  { %491 = vst.msk [vmem:[#allocation8] sm:$0xff] %vm490_vm0, %v489_v12 }
 0x230   :  { %728 = shalt.err (!%p725_p0)
}
 0x231   :  { %s729_s12 = scalar_lea.hbm %s842_s5, 128 }
 0x232   :  { %p730_p1 = scmp.ne.s32.totalorder %s842_s5, %s729_s12  ;;  %p733_p2 = scmp.lt.u32.totalorder %s729_s12, %s842_s5 }
 0x234   :  { %p735_p3 = pnand %p733_p2, %p730_p1 }
 0x236   :  { %738 = shalt.err (!%p735_p3)
}
 0x237   :  { %501 = dma.vmem_to_hbm [thread:$0]  %s499_s9, 128, %s842_s5, [#allocation4]  }
 0x238   :  { %743 = dma.done.wait [#allocation4], 128  }
 0x239   :  { %744 = vsyncadd [#allocation4], 4294967168 }
 0x23a   :  { %505 = vsyncpa [#allocation3], 1 }
 0x23b   :  { %506 = vsyncpa [#allocation6], 1 }
 0x23c   :  { %507 = vsyncpa [#allocation4], 1 }

</bundles_post_ra>
